<compile_context>
chip_gen: v5e
topology: v5e:2x2
jax: 0.10.0
libtpu: 0.0.40
codegen_flags: <defaults>
</compile_context>

<pallas_src>
import math
import functools

import jax
import jax.numpy as jnp
from jax import lax
from jax.experimental import pallas as pl
from jax.experimental.pallas import tpu as pltpu

EPS = 1e-5
NEG_SLOPE = 0.05
LANE = 128
VMEM_LIMIT = 32 * 1024 * 1024  # safe on v5e/v6e (128 MiB phys) and v7x (64 MiB) alike


def _round_up(x, m):
    return ((x + m - 1) // m) * m


# ----------------------------------------------------------------------------
# FUSED path: conv + InstanceNorm + LeakyReLU in a single kernel per sample.
# ----------------------------------------------------------------------------
def _fused_layer_kernel(x_ref, w_ref, o_ref):
    # x_ref : (1, Kp, S)   bf16 im2col columns (K-major, spatial on lanes)
    # w_ref : (Cout, Kp)   bf16 flattened conv weight
    # o_ref : (1, Cout, S) f32  normalized + LeakyReLU output
    y = jnp.dot(w_ref[...], x_ref[0], preferred_element_type=jnp.float32)  # (Cout, S)
    s = y.shape[1]
    mean = jnp.sum(y, axis=1, keepdims=True) * (1.0 / s)
    d = y - mean
    var = jnp.sum(d * d, axis=1, keepdims=True) * (1.0 / s)   # biased (PyTorch IN)
    inv = lax.rsqrt(var + EPS)
    yn = d * inv
    o_ref[0] = jnp.where(yn >= 0, yn, NEG_SLOPE * yn).astype(o_ref.dtype)


def fused_layer(x_cols, w_flat):
    N, Kp, S = x_cols.shape
    Cout = w_flat.shape[0]
    return pl.pallas_call(
        _fused_layer_kernel,
        out_shape=jax.ShapeDtypeStruct((N, Cout, S), jnp.float32),
        grid_spec=pltpu.PrefetchScalarGridSpec(
            num_scalar_prefetch=0,
            grid=(N,),
            in_specs=[
                pl.BlockSpec((1, Kp, S), lambda n: (n, 0, 0)),
                pl.BlockSpec((Cout, Kp), lambda n: (0, 0)),
            ],
            out_specs=pl.BlockSpec((1, Cout, S), lambda n: (n, 0, 0)),
        ),
        compiler_params=pltpu.CompilerParams(
            dimension_semantics=("parallel",),
            vmem_limit_bytes=VMEM_LIMIT,
        ),
    )(x_cols, w_flat)


# ----------------------------------------------------------------------------
# TILED path, pass A: conv-as-matmul + per-channel sum / sum-of-squares.
# ----------------------------------------------------------------------------
def _conv_stats_kernel(x_ref, w_ref, y_ref, s1_ref, s2_ref):
    # x_ref : (1, Kp, tS)   bf16 im2col columns
    # w_ref : (Cout, Kp)    bf16 flattened conv weight (resident across grid)
    # y_ref : (1, Cout, tS) f32  conv output tile (lane-dense in S)
    # s1/s2 : (1, Cout, 1)  f32  running per-channel sum / sum-of-squares
    s_idx = pl.program_id(1)

    y = jnp.dot(w_ref[...], x_ref[0], preferred_element_type=jnp.float32)
    y_ref[0] = y

    @pl.when(s_idx == 0)
    def _():
        s1_ref[...] = jnp.zeros_like(s1_ref)
        s2_ref[...] = jnp.zeros_like(s2_ref)

    s1_ref[0] = s1_ref[0] + jnp.sum(y, axis=1, keepdims=True)
    s2_ref[0] = s2_ref[0] + jnp.sum(y * y, axis=1, keepdims=True)


def conv_stats(x_cols, w_flat, s_tile):
    N, Kp, S = x_cols.shape
    Cout = w_flat.shape[0]
    n_s = S // s_tile
    return pl.pallas_call(
        _conv_stats_kernel,
        out_shape=(
            jax.ShapeDtypeStruct((N, Cout, S), jnp.float32),
            jax.ShapeDtypeStruct((N, Cout, 1), jnp.float32),
            jax.ShapeDtypeStruct((N, Cout, 1), jnp.float32),
        ),
        grid_spec=pltpu.PrefetchScalarGridSpec(
            num_scalar_prefetch=0,
            grid=(N, n_s),
            in_specs=[
                pl.BlockSpec((1, Kp, s_tile), lambda n, s: (n, 0, s)),
                pl.BlockSpec((Cout, Kp), lambda n, s: (0, 0)),
            ],
            out_specs=[
                pl.BlockSpec((1, Cout, s_tile), lambda n, s: (n, 0, s)),
                pl.BlockSpec((1, Cout, 1), lambda n, s: (n, 0, 0)),
                pl.BlockSpec((1, Cout, 1), lambda n, s: (n, 0, 0)),
            ],
        ),
        compiler_params=pltpu.CompilerParams(
            dimension_semantics=("parallel", "arbitrary"),
            vmem_limit_bytes=VMEM_LIMIT,
        ),
    )(x_cols, w_flat)


# ----------------------------------------------------------------------------
# TILED path, pass B: InstanceNorm normalize + LeakyReLU, in place on y.
# ----------------------------------------------------------------------------
def _norm_lrelu_kernel(y_ref, mu_ref, inv_ref, o_ref):
    yn = (y_ref[0] - mu_ref[0]) * inv_ref[0]
    o_ref[0] = jnp.where(yn >= 0, yn, NEG_SLOPE * yn).astype(o_ref.dtype)


def norm_lrelu(y, mu, inv, s_tile):
    N, Cout, S = y.shape
    n_s = S // s_tile
    return pl.pallas_call(
        _norm_lrelu_kernel,
        out_shape=jax.ShapeDtypeStruct((N, Cout, S), jnp.float32),
        grid_spec=pltpu.PrefetchScalarGridSpec(
            num_scalar_prefetch=0,
            grid=(N, n_s),
            in_specs=[
                pl.BlockSpec((1, Cout, s_tile), lambda n, s: (n, 0, s)),
                pl.BlockSpec((1, Cout, 1), lambda n, s: (n, 0, 0)),
                pl.BlockSpec((1, Cout, 1), lambda n, s: (n, 0, 0)),
            ],
            out_specs=pl.BlockSpec((1, Cout, s_tile), lambda n, s: (n, 0, s)),
        ),
        compiler_params=pltpu.CompilerParams(
            dimension_semantics=("parallel", "parallel"),
            vmem_limit_bytes=VMEM_LIMIT,
        ),
        input_output_aliases={0: 0},  # reuse the conv buffer for the result
    )(y, mu, inv)


# ----------------------------------------------------------------------------
# Plain-JAX glue: K-major im2col (bf16) + weight flattening, NCDHW throughout.
# ----------------------------------------------------------------------------
def im2col_kmajor(x_ncdhw, k_pad):
    """(N, C, D, H, W) -> (N, k_pad, D*H*W) bf16; K index = c*27 + kd*9+kh*3+kw."""
    N, C, D, H, W = x_ncdhw.shape
    xp = jnp.pad(x_ncdhw.astype(jnp.bfloat16),
                 ((0, 0), (0, 0), (1, 1), (1, 1), (1, 1)))
    patches = []
    for kd in range(3):
        for kh in range(3):
            for kw in range(3):
                patches.append(xp[:, :, kd:kd + D, kh:kh + H, kw:kw + W])
    p = jnp.stack(patches, axis=2)                    # (N, C, 27, D, H, W)
    p = p.reshape(N, C * 27, D * H * W)               # (N, 27*C, S), S on lanes
    if k_pad > C * 27:
        p = jnp.pad(p, ((0, 0), (0, k_pad - C * 27), (0, 0)))
    return p


def flatten_weight(w_oidhw, k_pad):
    """(Cout, Cin, 3, 3, 3) -> (Cout, k_pad) bf16, column order matching im2col."""
    Cout, Cin = w_oidhw.shape[0], w_oidhw.shape[1]
    w = w_oidhw.reshape(Cout, Cin * 27).astype(jnp.bfloat16)
    if k_pad > Cin * 27:
        w = jnp.pad(w, ((0, 0), (0, k_pad - Cin * 27)))
    return w


def _fused_vmem_bytes(Kp, Cout, S):
    x_blk = Kp * S * 2          # bf16 im2col block
    w_blk = Cout * Kp * 2
    o_blk = Cout * S * 4
    work = 4 * Cout * S * 4     # y / d / yn temporaries (f32)
    return 2 * x_blk + 2 * w_blk + 2 * o_blk + work


def _choose_s_tile(S, Kp, Cout, requested=None):
    if requested is not None and requested % LANE == 0 and S % requested == 0:
        return requested
    # Per-lane VMEM cost: x dbl-buf (bf16) + y dbl-buf (f32) + temporaries.
    per_lane = 2 * Kp * 2 + 2 * Cout * 4 + 4 * Cout * 4
    cap = (VMEM_LIMIT // 2) // max(per_lane, 1)
    cap = max(LANE, (cap // LANE) * LANE)
    max_tile = min(4096, cap)
    best = None
    t = LANE
    while t <= min(S, max_tile):
        if S % t == 0:
            best = t
        t += LANE
    return best if best is not None else S  # fall back to full-extent block


def conv_block_layer(x_ncdhw, w_oidhw, s_tile=None, force_tiled=False):
    """One (Conv3d 3x3x3 pad1 -> InstanceNorm3d -> Dropout3d(eval) -> LeakyReLU)."""
    N, Cin, D, H, W = x_ncdhw.shape
    Cout = w_oidhw.shape[0]
    S = D * H * W
    Kp = _round_up(27 * Cin, LANE)

    x_cols = im2col_kmajor(x_ncdhw, Kp)               # (N, Kp, S) bf16
    w_flat = flatten_weight(w_oidhw, Kp)              # (Cout, Kp) bf16

    if (not force_tiled) and _fused_vmem_bytes(Kp, Cout, S) <= VMEM_LIMIT // 2:
        out = fused_layer(x_cols, w_flat)             # conv+IN+LeakyReLU, one pass
    else:
        tS = _choose_s_tile(S, Kp, Cout, s_tile)
        y, ysum, ysumsq = conv_stats(x_cols, w_flat, tS)
        mean = ysum / S
        var = ysumsq / S - mean * mean                # biased variance (PyTorch IN)
        inv = lax.rsqrt(jnp.maximum(var, 0.0) + EPS)
        out = norm_lrelu(y, mean, inv, tS)            # in place on the conv buffer
    return out.reshape(N, Cout, D, H, W)              # already NCDHW, no transpose


# ----------------------------------------------------------------------------
# UpConvBlock parameters + forward.
# ----------------------------------------------------------------------------
def init_upconvblock_params(key, in_chans: int, out_chans: int):
    mid = in_chans // 2
    shapes = [
        ((mid, in_chans, 3, 3, 3), (mid,)),
        ((mid, mid, 3, 3, 3), (mid,)),
        ((out_chans, mid, 3, 3, 3), (out_chans,)),
    ]
    params = []
    for (ws, bs) in shapes:
        key, kw, kb = jax.random.split(key, 3)
        fan_in = ws[1] * 27
        bound = 1.0 / math.sqrt(fan_in)  # PyTorch default conv init range
        w = jax.random.uniform(kw, ws, jnp.float32, -bound, bound)
        b = jax.random.uniform(kb, bs, jnp.float32, -bound, bound)
        params.append((w, b))
    return params


@functools.partial(jax.jit, static_argnames=("s_tile", "force_tiled"))
def upconvblock_forward(x_ncdhw, params, s_tile=None, force_tiled=False):
    y = x_ncdhw
    for (w, _b) in params:
        # The conv bias is exactly cancelled by InstanceNorm3d(affine=False)
        # mean subtraction, so it is not applied in the kernel path.
        y = conv_block_layer(y, w, s_tile, force_tiled)
    return y


# ----------------------------------------------------------------------------
# Pure-JAX reference (f32 lax.conv, bias included) for correctness check.
# ----------------------------------------------------------------------------
def reference_forward(x, params):
    y = x
    for (w, b) in params:
        y = lax.conv_general_dilated(
            y, w, window_strides=(1, 1, 1), padding=((1, 1), (1, 1), (1, 1)),
            dimension_numbers=("NCDHW", "OIDHW", "NCDHW"))
        y = y + b.reshape(1, -1, 1, 1, 1)
        mean = jnp.mean(y, axis=(2, 3, 4), keepdims=True)
        var = jnp.mean((y - mean) ** 2, axis=(2, 3, 4), keepdims=True)
        y = (y - mean) * lax.rsqrt(var + EPS)
        y = jnp.where(y >= 0, y, NEG_SLOPE * y)
    return y


if __name__ == "__main__":
    key = jax.random.PRNGKey(0)
    k_x, k_p = jax.random.split(key)

    N, in_chans, out_chans = 2, 4, 4
    D = H = W = 8  # S = D*H*W = 512

    x = jax.random.normal(k_x, (N, in_chans, D, H, W), jnp.float32)
    params = init_upconvblock_params(k_p, in_chans, out_chans)

    ref = reference_forward(x, params)

    # Fused (single-kernel-per-layer) path — default at this size.
    out = upconvblock_forward(x, params)
    out = jax.block_until_ready(out)
    assert out.shape == (N, out_chans, D, H, W), out.shape
    err_fused = float(jnp.max(jnp.abs(out - ref)))

    # Also exercise the S-tiled two-pass path (used when S is too big for VMEM).
    out_t = upconvblock_forward(x, params, s_tile=128, force_tiled=True)
    out_t = jax.block_until_ready(out_t)
    err_tiled = float(jnp.max(jnp.abs(out_t - ref)))

    # bf16 MXU operands (f32 accumulation / statistics) across 3 stacked layers.
    assert err_fused < 5e-2, err_fused
    assert err_tiled < 5e-2, err_tiled

    print("KERNEL_OK")
</pallas_src>

<mosaic_0001>
module attributes {stable_mosaic.version = 11 : i64} {
  func.func @_fused_layer_kernel(%arg0: i32, %arg1: memref<1x128x512xbf16, #tpu.memory_space<vmem>>, %arg2: memref<2x128xbf16, #tpu.memory_space<vmem>>, %arg3: memref<1x2x512xf32, #tpu.memory_space<vmem>>) attributes {dimension_semantics = [#tpu.dimension_semantics<parallel>], iteration_bounds = array<i64: 2>, scalar_prefetch = 0 : i64, scratch_operands = 0 : i64, tpu.core_type = #tpu.core_type<tc>, window_params = [{transform_indices = @transform_0, window_bounds = array<i64: 1, 128, 512>}, {pipeline_mode = #tpu.pipeline_mode<synchronous>, transform_indices = @transform_1, window_bounds = array<i64: 2, 128>}, {transform_indices = @transform_2, window_bounds = array<i64: 1, 2, 512>}]} {
    %c0 = arith.constant 0 : index
    %c0_0 = arith.constant 0 : index
    %0 = vector.load %arg2[%c0, %c0_0] : memref<2x128xbf16, #tpu.memory_space<vmem>>, vector<2x128xbf16>
    %c0_1 = arith.constant 0 : index
    %c0_2 = arith.constant 0 : index
    %c0_3 = arith.constant 0 : index
    %1 = vector.load %arg1[%c0_1, %c0_2, %c0_3] : memref<1x128x512xbf16, #tpu.memory_space<vmem>>, vector<1x128x512xbf16>
    %2 = vector.shape_cast %1 : vector<1x128x512xbf16> to vector<128x512xbf16>
    %cst = arith.constant dense<0.000000e+00> : vector<2x512xf32>
    %3 = tpu.matmul %0, %2, %cst {dimension_numbers = #tpu.dot_dimension_numbers<[1], [0], [0], [1], [0, 0, 1, 1], [], []>} : vector<2x128xbf16>, vector<128x512xbf16>, vector<2x512xf32> -> vector<2x512xf32>
    %cst_4 = arith.constant dense<0.000000e+00> : vector<2xf32>
    %4 = vector.multi_reduction <add>, %3, %cst_4 [1] : vector<2x512xf32> to vector<2xf32>
    %5 = vector.shape_cast %4 : vector<2xf32> to vector<2x1xf32>
    %cst_5 = arith.constant 0.001953125 : f32
    %6 = vector.broadcast %cst_5 : f32 to vector<2x1xf32>
    %7 = arith.mulf %5, %6 : vector<2x1xf32>
    %8 = vector.broadcast %7 : vector<2x1xf32> to vector<2x512xf32>
    %9 = arith.subf %3, %8 : vector<2x512xf32>
    %10 = arith.mulf %9, %9 : vector<2x512xf32>
    %cst_6 = arith.constant dense<0.000000e+00> : vector<2xf32>
    %11 = vector.multi_reduction <add>, %10, %cst_6 [1] : vector<2x512xf32> to vector<2xf32>
    %12 = vector.shape_cast %11 : vector<2xf32> to vector<2x1xf32>
    %cst_7 = arith.constant 0.001953125 : f32
    %13 = vector.broadcast %cst_7 : f32 to vector<2x1xf32>
    %14 = arith.mulf %12, %13 : vector<2x1xf32>
    %cst_8 = arith.constant 9.99999974E-6 : f32
    %15 = vector.broadcast %cst_8 : f32 to vector<2x1xf32>
    %16 = arith.addf %14, %15 : vector<2x1xf32>
    %17 = math.rsqrt %16 : vector<2x1xf32>
    %18 = vector.broadcast %17 : vector<2x1xf32> to vector<2x512xf32>
    %19 = arith.mulf %9, %18 : vector<2x512xf32>
    %cst_9 = arith.constant 0.000000e+00 : f32
    %20 = vector.broadcast %cst_9 : f32 to vector<2x512xf32>
    %21 = arith.cmpf oge, %19, %20 : vector<2x512xf32>
    %cst_10 = arith.constant 5.000000e-02 : f32
    %22 = vector.broadcast %cst_10 : f32 to vector<2x512xf32>
    %23 = arith.mulf %22, %19 : vector<2x512xf32>
    %24 = arith.select %21, %19, %23 : vector<2x512xi1>, vector<2x512xf32>
    %c0_11 = arith.constant 0 : index
    %c0_12 = arith.constant 0 : index
    %c0_13 = arith.constant 0 : index
    %25 = vector.load %arg3[%c0_11, %c0_12, %c0_13] : memref<1x2x512xf32, #tpu.memory_space<vmem>>, vector<1x2x512xf32>
    %26 = vector.shape_cast %25 : vector<1x2x512xf32> to vector<2x512xf32>
    %27 = vector.shape_cast %24 : vector<2x512xf32> to vector<1x2x512xf32>
    tpu.vector_store %arg3[%c0_11, %c0_12, %c0_13], %27 {strides = array<i32>} : memref<1x2x512xf32, #tpu.memory_space<vmem>>, vector<1x2x512xf32>,
    return
  }
  func.func @transform_0(%arg0: i32) -> (i32, i32, i32) {
    %c0_i32 = arith.constant 0 : i32
    %c0_i32_0 = arith.constant 0 : i32
    %c0_i32_1 = arith.constant 0 : i32
    return %arg0, %c0_i32, %c0_i32_0 : i32, i32, i32
  }
  func.func @transform_1(%arg0: i32) -> (i32, i32) {
    %c0_i32 = arith.constant 0 : i32
    %c0_i32_0 = arith.constant 0 : i32
    %c0_i32_1 = arith.constant 0 : i32
    return %c0_i32, %c0_i32_0 : i32, i32
  }
  func.func @transform_2(%arg0: i32) -> (i32, i32, i32) {
    %c0_i32 = arith.constant 0 : i32
    %c0_i32_0 = arith.constant 0 : i32
    %c0_i32_1 = arith.constant 0 : i32
    return %arg0, %c0_i32, %c0_i32_0 : i32, i32, i32
  }
}

module attributes {stable_mosaic.version = 11 : i64} {
  func.func @_fused_layer_kernel(%arg0: i32, %arg1: memref<1x128x512xbf16, #tpu.memory_space<vmem>>, %arg2: memref<4x128xbf16, #tpu.memory_space<vmem>>, %arg3: memref<1x4x512xf32, #tpu.memory_space<vmem>>) attributes {dimension_semantics = [#tpu.dimension_semantics<parallel>], iteration_bounds = array<i64: 2>, scalar_prefetch = 0 : i64, scratch_operands = 0 : i64, tpu.core_type = #tpu.core_type<tc>, window_params = [{transform_indices = @transform_0, window_bounds = array<i64: 1, 128, 512>}, {pipeline_mode = #tpu.pipeline_mode<synchronous>, transform_indices = @transform_1, window_bounds = array<i64: 4, 128>}, {transform_indices = @transform_2, window_bounds = array<i64: 1, 4, 512>}]} {
    %c0 = arith.constant 0 : index
    %c0_0 = arith.constant 0 : index
    %0 = vector.load %arg2[%c0, %c0_0] : memref<4x128xbf16, #tpu.memory_space<vmem>>, vector<4x128xbf16>
    %c0_1 = arith.constant 0 : index
    %c0_2 = arith.constant 0 : index
    %c0_3 = arith.constant 0 : index
    %1 = vector.load %arg1[%c0_1, %c0_2, %c0_3] : memref<1x128x512xbf16, #tpu.memory_space<vmem>>, vector<1x128x512xbf16>
    %2 = vector.shape_cast %1 : vector<1x128x512xbf16> to vector<128x512xbf16>
    %cst = arith.constant dense<0.000000e+00> : vector<4x512xf32>
    %3 = tpu.matmul %0, %2, %cst {dimension_numbers = #tpu.dot_dimension_numbers<[1], [0], [0], [1], [0, 0, 1, 1], [], []>} : vector<4x128xbf16>, vector<128x512xbf16>, vector<4x512xf32> -> vector<4x512xf32>
    %cst_4 = arith.constant dense<0.000000e+00> : vector<4xf32>
    %4 = vector.multi_reduction <add>, %3, %cst_4 [1] : vector<4x512xf32> to vector<4xf32>
    %5 = vector.shape_cast %4 : vector<4xf32> to vector<4x1xf32>
    %cst_5 = arith.constant 0.001953125 : f32
    %6 = vector.broadcast %cst_5 : f32 to vector<4x1xf32>
    %7 = arith.mulf %5, %6 : vector<4x1xf32>
    %8 = vector.broadcast %7 : vector<4x1xf32> to vector<4x512xf32>
    %9 = arith.subf %3, %8 : vector<4x512xf32>
    %10 = arith.mulf %9, %9 : vector<4x512xf32>
    %cst_6 = arith.constant dense<0.000000e+00> : vector<4xf32>
    %11 = vector.multi_reduction <add>, %10, %cst_6 [1] : vector<4x512xf32> to vector<4xf32>
    %12 = vector.shape_cast %11 : vector<4xf32> to vector<4x1xf32>
    %cst_7 = arith.constant 0.001953125 : f32
    %13 = vector.broadcast %cst_7 : f32 to vector<4x1xf32>
    %14 = arith.mulf %12, %13 : vector<4x1xf32>
    %cst_8 = arith.constant 9.99999974E-6 : f32
    %15 = vector.broadcast %cst_8 : f32 to vector<4x1xf32>
    %16 = arith.addf %14, %15 : vector<4x1xf32>
    %17 = math.rsqrt %16 : vector<4x1xf32>
    %18 = vector.broadcast %17 : vector<4x1xf32> to vector<4x512xf32>
    %19 = arith.mulf %9, %18 : vector<4x512xf32>
    %cst_9 = arith.constant 0.000000e+00 : f32
    %20 = vector.broadcast %cst_9 : f32 to vector<4x512xf32>
    %21 = arith.cmpf oge, %19, %20 : vector<4x512xf32>
    %cst_10 = arith.constant 5.000000e-02 : f32
    %22 = vector.broadcast %cst_10 : f32 to vector<4x512xf32>
    %23 = arith.mulf %22, %19 : vector<4x512xf32>
    %24 = arith.select %21, %19, %23 : vector<4x512xi1>, vector<4x512xf32>
    %c0_11 = arith.constant 0 : index
    %c0_12 = arith.constant 0 : index
    %c0_13 = arith.constant 0 : index
    %25 = vector.load %arg3[%c0_11, %c0_12, %c0_13] : memref<1x4x512xf32, #tpu.memory_space<vmem>>, vector<1x4x512xf32>
    %26 = vector.shape_cast %25 : vector<1x4x512xf32> to vector<4x512xf32>
    %27 = vector.shape_cast %24 : vector<4x512xf32> to vector<1x4x512xf32>
    tpu.vector_store %arg3[%c0_11, %c0_12, %c0_13], %27 {strides = array<i32>} : memref<1x4x512xf32, #tpu.memory_space<vmem>>, vector<1x4x512xf32>,
    return
  }
  func.func @transform_0(%arg0: i32) -> (i32, i32, i32) {
    %c0_i32 = arith.constant 0 : i32
    %c0_i32_0 = arith.constant 0 : i32
    %c0_i32_1 = arith.constant 0 : i32
    return %arg0, %c0_i32, %c0_i32_0 : i32, i32, i32
  }
  func.func @transform_1(%arg0: i32) -> (i32, i32) {
    %c0_i32 = arith.constant 0 : i32
    %c0_i32_0 = arith.constant 0 : i32
    %c0_i32_1 = arith.constant 0 : i32
    return %c0_i32, %c0_i32_0 : i32, i32
  }
  func.func @transform_2(%arg0: i32) -> (i32, i32, i32) {
    %c0_i32 = arith.constant 0 : i32
    %c0_i32_0 = arith.constant 0 : i32
    %c0_i32_1 = arith.constant 0 : i32
    return %arg0, %c0_i32, %c0_i32_0 : i32, i32, i32
  }
}

</mosaic_0001>

<bundles_post_ra>
// kernel: upconvblock_forward.3
= control target key start
LH: loop header
LB: loop body
LE: loop exit
PB: predicated region body
PF: predicated region fallthrough
CT: control target
= control target key end

     0   :  { %s720_s9 = smov 0   ;;  %s819_s0 = inlined_call_operand.vmem [shape: bf16[2,128,512], index: 0, kind: input, shape index: {}]   ;;  %s820_s1 = inlined_call_operand.vmem [shape: bf16[2,128], index: 1, kind: input, shape index: {}]   ;;  %s821_s2 = inlined_call_operand.vmem [shape: f32[2,2,512], index: 2, kind: output, shape index: {}]  }
   0x1 LB: > { %s514_s10 = sadd.s32 4294967295, %s703_s9   ;;  %p518_p0 = scmp.ge.s32.totalorder %s703_s9, 1  ;;  %s703_s9 = sphi %s720_s9, %s12_s9  }
   0x2   : > { %p112_p1 = scmp.lt.s32.totalorder %s703_s9, 3 }
   0x4   : > { %p113_p2 = pnand %p518_p0, %p112_p1 }
   0x5   : > { %p134_p3 = scmp.lt.s32.totalorder (!%p113_p2), %s514_s10, 1 }
   0x6   : > { %116 = sbr.rel (%p113_p2) target bundleno = 465 (0x1d1), region = 28 }
   0xb   : > { %s823_s10 = smov (!%p134_p3, %s514_s10), 1  ;;  %vm389_vm0 = vcmask 1041408   ;;  %vm453_vm8 = vcmask 1045508   ;;  %vm455_vm9 = vcmask 1043456  }
   0xc   : > { %s653_s11 = sshll.u32 %s823_s10, 8  ;;  %s654_s17 = sshll.u32 %s823_s10, 3 }
   0xd   : > { %s734_s14 = scalar_lea.vmem %s819_s0, %s653_s11  ;;  %s143_s20 = scalar_lea.vmem %s821_s2, %s654_s17 }
   0xe   : > { %v637_v0 = vld [vmem:[%s734_s14 + $0xe0] sm:$0xf]  ;;  %v685_v1 = vld [vmem:[%s734_s14 + $0xec] sm:$0xf0]  ;;  %v683_v2 = vld [vmem:[%s734_s14 + $0xe4] sm:$0xf] }
   0xf   : > { %v638_v3 = vor.u32 %v685_v1, %v637_v0  ;;  %v639_v4 = vld [vmem:[%s734_s14 + $0xf0] sm:$0xf0]  ;;  %v645_v5 = vld [vmem:[%s734_s14 + $0xe8] sm:$0xf]  ;;  %v686_v6 = vld [vmem:[%s734_s14 + $0xf4] sm:$0xf0] }
  0x10   : > { %v642_v7 = vor.u32 %v683_v2, %v639_v4  ;;  %v646_v8 = vor.u32 %v686_v6, %v645_v5  ;;  %v684_v9 = vld [vmem:[%s734_s14 + $0xec] sm:$0xf]  ;;  %v647_v10 = vld [vmem:[%s734_s14 + $0xf8] sm:$0xf0]  ;;  %v621_v11 = vld [vmem:[%s734_s14 + $0xc0] sm:$0xf] }
  0x11   : > { %337 = vmatpush.bf16.msra.mxu0 %v638_v3  ;;  %v650_v12 = vor.u32 %v684_v9, %v647_v10  ;;  %v681_v13 = vld [vmem:[%s734_s14 + $0xcc] sm:$0xf0]  ;;  %v679_v14 = vld [vmem:[%s734_s14 + $0xc4] sm:$0xf]  ;;  %v623_v15 = vld [vmem:[%s734_s14 + $0xd0] sm:$0xf0] }
  0x12   : > { %350 = vmatpush.bf16.msra.mxu1 %v642_v7  ;;  %363 = vmatpush.bf16.msra.mxu2 %v646_v8  ;;  %v622_v16 = vor.u32 %v681_v13, %v621_v11  ;;  %v626_v17 = vor.u32 %v679_v14, %v623_v15  ;;  %v629_v18 = vld [vmem:[%s734_s14 + $0xc8] sm:$0xf]  ;;  %v682_v19 = vld [vmem:[%s734_s14 + $0xd4] sm:$0xf0]  ;;  %v680_v20 = vld [vmem:[%s734_s14 + $0xcc] sm:$0xf] }
  0x13   : > { %376 = vmatpush.bf16.msra.mxu3 %v650_v12  ;;  %v630_v21 = vor.u32 %v682_v19, %v629_v18  ;;  %v631_v22 = vld [vmem:[%s734_s14 + $0xd8] sm:$0xf0]  ;;  %v605_v23 = vld [vmem:[%s734_s14 + $0xa0] sm:$0xf]  ;;  %v677_v24 = vld [vmem:[%s734_s14 + $0xac] sm:$0xf0] }
  0x14   : > { %v634_v25 = vor.u32 %v680_v20, %v631_v22  ;;  %v675_v26 = vld [vmem:[%s734_s14 + $0xa4] sm:$0xf]  ;;  %v607_v27 = vld [vmem:[%s734_s14 + $0xb0] sm:$0xf0]  ;;  %v613_v28 = vld [vmem:[%s734_s14 + $0xa8] sm:$0xf]  ;;  %v606_v29 = vor.u32 %v677_v24, %v605_v23 }
  0x15   : > { %338 = vmatpush.bf16.msra.mxu0 %v622_v16  ;;  %v678_v30 = vld [vmem:[%s734_s14 + $0xb4] sm:$0xf0]  ;;  %v676_v31 = vld [vmem:[%s734_s14 + $0xac] sm:$0xf]  ;;  %v615_v32 = vld [vmem:[%s734_s14 + $0xb8] sm:$0xf0]  ;;  %v610_v33 = vor.u32 %v675_v26, %v607_v27 }
  0x16   : > { %351 = vmatpush.bf16.msra.mxu1 %v626_v17  ;;  %364 = vmatpush.bf16.msra.mxu2 %v630_v21  ;;  %v614_v34 = vor.u32 %v678_v30, %v613_v28  ;;  %v589_v35 = vld [vmem:[%s734_s14 + $0x80] sm:$0xf]  ;;  %v673_v36 = vld [vmem:[%s734_s14 + $0x8c] sm:$0xf0]  ;;  %v671_v37 = vld [vmem:[%s734_s14 + $0x84] sm:$0xf]  ;;  %v618_v38 = vor.u32 %v676_v31, %v615_v32 }
  0x17   : > { %377 = vmatpush.bf16.msra.mxu3 %v634_v25  ;;  %v591_v39 = vld [vmem:[%s734_s14 + $0x90] sm:$0xf0]  ;;  %v597_v40 = vld [vmem:[%s734_s14 + $0x88] sm:$0xf]  ;;  %v674_v41 = vld [vmem:[%s734_s14 + $0x94] sm:$0xf0]  ;;  %v590_v44 = vor.u32 %v673_v36, %v589_v35 }
  0x18   : > { %v672_v42 = vld [vmem:[%s734_s14 + $0x8c] sm:$0xf]  ;;  %v599_v43 = vld [vmem:[%s734_s14 + $0x98] sm:$0xf0]  ;;  %v594_v45 = vor.u32 %v671_v37, %v591_v39  ;;  %v598_v46 = vor.u32 %v674_v41, %v597_v40  ;;  %v573_v47 = vld [vmem:[%s734_s14 + $0x60] sm:$0xf] }
  0x19   : > { %339 = vmatpush.bf16.msra.mxu0 %v606_v29  ;;  %v669_v48 = vld [vmem:[%s734_s14 + $0x6c] sm:$0xf0]  ;;  %v667_v49 = vld [vmem:[%s734_s14 + $0x64] sm:$0xf]  ;;  %v602_v50 = vor.u32 %v672_v42, %v599_v43  ;;  %v575_v51 = vld [vmem:[%s734_s14 + $0x70] sm:$0xf0] }
  0x1a   : > { %352 = vmatpush.bf16.msra.mxu1 %v610_v33  ;;  %365 = vmatpush.bf16.msra.mxu2 %v614_v34  ;;  %v581_v52 = vld [vmem:[%s734_s14 + $0x68] sm:$0xf]  ;;  %v670_v53 = vld [vmem:[%s734_s14 + $0x74] sm:$0xf0]  ;;  %v668_v54 = vld [vmem:[%s734_s14 + $0x6c] sm:$0xf]  ;;  %v574_v56 = vor.u32 %v669_v48, %v573_v47  ;;  %v578_v57 = vor.u32 %v667_v49, %v575_v51 }
  0x1b   : > { %378 = vmatpush.bf16.msra.mxu3 %v618_v38  ;;  %v583_v55 = vld [vmem:[%s734_s14 + $0x78] sm:$0xf0]  ;;  %v582_v58 = vor.u32 %v670_v53, %v581_v52  ;;  %v557_v59 = vld [vmem:[%s734_s14 + $0x40] sm:$0xf]  ;;  %v665_v60 = vld [vmem:[%s734_s14 + $0x4c] sm:$0xf0] }
  0x1c   : > { %v663_v61 = vld [vmem:[%s734_s14 + $0x44] sm:$0xf]  ;;  %v586_v62 = vor.u32 %v668_v54, %v583_v55  ;;  %v559_v63 = vld [vmem:[%s734_s14 + $0x50] sm:$0xf0]  ;;  %v565_v0 = vld [vmem:[%s734_s14 + $0x48] sm:$0xf]  ;;  %v558_v4 = vor.u32 %v665_v60, %v557_v59 }
  0x1d   : > { %340 = vmatpush.bf16.msra.mxu0 %v590_v44  ;;  %v666_v1 = vld [vmem:[%s734_s14 + $0x54] sm:$0xf0]  ;;  %v664_v2 = vld [vmem:[%s734_s14 + $0x4c] sm:$0xf]  ;;  %v567_v3 = vld [vmem:[%s734_s14 + $0x58] sm:$0xf0]  ;;  %v562_v5 = vor.u32 %v663_v61, %v559_v63 }
  0x1e   : > { %353 = vmatpush.bf16.msra.mxu1 %v594_v45  ;;  %366 = vmatpush.bf16.msra.mxu2 %v598_v46  ;;  %v566_v6 = vor.u32 %v666_v1, %v565_v0  ;;  %v541_v7 = vld [vmem:[%s734_s14 + $0x20] sm:$0xf]  ;;  %v661_v8 = vld [vmem:[%s734_s14 + $0x2c] sm:$0xf0]  ;;  %v659_v9 = vld [vmem:[%s734_s14 + $0x24] sm:$0xf]  ;;  %v570_v10 = vor.u32 %v664_v2, %v567_v3 }
  0x1f   : > { %379 = vmatpush.bf16.msra.mxu3 %v602_v50  ;;  %v543_v11 = vld [vmem:[%s734_s14 + $0x30] sm:$0xf0]  ;;  %v549_v12 = vld [vmem:[%s734_s14 + $0x28] sm:$0xf]  ;;  %v662_v13 = vld [vmem:[%s734_s14 + $0x34] sm:$0xf0]  ;;  %v542_v16 = vor.u32 %v661_v8, %v541_v7 }
  0x20   : > { %v660_v14 = vld [vmem:[%s734_s14 + $0x2c] sm:$0xf]  ;;  %v551_v15 = vld [vmem:[%s734_s14 + $0x38] sm:$0xf0]  ;;  %v546_v17 = vor.u32 %v659_v9, %v543_v11  ;;  %v550_v18 = vor.u32 %v662_v13, %v549_v12  ;;  %v525_v19 = vld [vmem:[%s734_s14] sm:$0xf] }
  0x21   : > { %341 = vmatpush.bf16.msra.mxu0 %v574_v56  ;;  %v657_v20 = vld [vmem:[%s734_s14 + $0xc] sm:$0xf0]  ;;  %v655_v21 = vld [vmem:[%s734_s14 + $0x4] sm:$0xf]  ;;  %v554_v22 = vor.u32 %v660_v14, %v551_v15  ;;  %v527_v23 = vld [vmem:[%s734_s14 + $0x10] sm:$0xf0] }
  0x22   : > { %354 = vmatpush.bf16.msra.mxu1 %v578_v57  ;;  %367 = vmatpush.bf16.msra.mxu2 %v582_v58  ;;  %v533_v24 = vld [vmem:[%s734_s14 + $0x8] sm:$0xf]  ;;  %v658_v25 = vld [vmem:[%s734_s14 + $0x14] sm:$0xf0]  ;;  %v656_v26 = vld [vmem:[%s734_s14 + $0xc] sm:$0xf]  ;;  %v526_v28 = vor.u32 %v657_v20, %v525_v19  ;;  %v530_v29 = vor.u32 %v655_v21, %v527_v23 }
  0x23   : > { %380 = vmatpush.bf16.msra.mxu3 %v586_v62  ;;  %v535_v27 = vld [vmem:[%s734_s14 + $0x18] sm:$0xf0]  ;;  %v534_v30 = vor.u32 %v658_v25, %v533_v24  ;;  %v144_v32 = vld [vmem:[%s820_s1] sm:$0x1] }
  0x24   : > { %v538_v31 = vor.u32 %v656_v26, %v535_v27 }
  0x25   : > { %342 = vmatpush.bf16.msra.mxu0 %v558_v4 }
  0x26   : > { %355 = vmatpush.bf16.msra.mxu1 %v562_v5  ;;  %368 = vmatpush.bf16.msra.mxu2 %v566_v6 }
  0x27   : > { %381 = vmatpush.bf16.msra.mxu3 %v570_v10 }
  0x29   : > { %343 = vmatpush.bf16.msra.mxu0 %v542_v16 }
  0x2a   : > { %356 = vmatpush.bf16.msra.mxu1 %v546_v17  ;;  %369 = vmatpush.bf16.msra.mxu2 %v550_v18 }
  0x2b   : > { %382 = vmatpush.bf16.msra.mxu3 %v554_v22 }
  0x2d   : > { %344 = vmatpush.bf16.msra.mxu0 %v526_v28 }
  0x2e   : > { %357 = vmatpush.bf16.msra.mxu1 %v530_v29  ;;  %370 = vmatpush.bf16.msra.mxu2 %v534_v30 }
  0x2f   : > { %383 = vmatpush.bf16.msra.mxu3 %v538_v31 }
  0x30   : > { %345 = vmatmul.bf16.vlgmr.msra.gmra.mxu0 %v144_v32 }
  0x31   : > { %358 = vmatmul.bf16.vlgmr.msra.gmra.mxu1 %v144_v32  ;;  %371 = vmatmul.bf16.vlgmr.msra.gmra.mxu2 %v144_v32 }
  0x32   : > { %384 = vmatmul.bf16.vlgmr.msra.gmra.mxu3 %v144_v32 }
  0xad   : > { %v346_v33 = vpop.f32.mrf.mxu0 }
  0xae   : > { %v359_v34 = vpop.f32.mrf.mxu1  ;;  %v390_v35 = vsel %vm389_vm0, %v346_v33, 0.0 }
  0xaf   : > { %v391_v36 = vsel %vm389_vm0, %v359_v34, 0.0 }
  0xb0   : > { %v392_v37 = vadd.f32 %v391_v36, %v390_v35 }
  0xb4   : > { %v372_v38 = vpop.f32.mrf.mxu2 }
  0xb5   : > { %v393_v39 = vsel %vm389_vm0, %v372_v38, 0.0  ;;  %v385_v40 = vpop.f32.mrf.mxu3  ;;  %v348_v41 = vpop.f32.mrf.mxu0 }
  0xb6   : > { %v361_v42 = vpop.f32.mrf.mxu1  ;;  %v394_v43 = vadd.f32 %v393_v39, %v392_v37  ;;  %v395_v44 = vsel %vm389_vm0, %v385_v40, 0.0 }
  0xb8   : > { %v396_v45 = vadd.f32 %v395_v44, %v394_v43 }
  0xba   : > { %397 = vadd.xlane.f32.xlu0 %v396_v45 }
  0xbc   : > { %v374_v46 = vpop.f32.mrf.mxu2 }
  0xbd   : > { %v387_v47 = vpop.f32.mrf.mxu3 }
 0x12d   : > { %v398_v48 = vpop.xlane.xlu0 %397 }
 0x12e   : > { %v399_v49 = vmul.f32 0.001953125, %v398_v48 }
 0x130   : > { %v400_v50 = vsub.f32 %v346_v33, %v399_v49  ;;  %v401_v51 = vsub.f32 %v359_v34, %v399_v49  ;;  %v402_v52 = vsub.f32 %v372_v38, %v399_v49  ;;  %v403_v53 = vsub.f32 %v385_v40, %v399_v49 }
 0x132   : > { %v404_v54 = vmul.f32 %v400_v50, %v400_v50  ;;  %v405_v55 = vmul.f32 %v401_v51, %v401_v51  ;;  %v406_v56 = vmul.f32 %v402_v52, %v402_v52  ;;  %v407_v57 = vmul.f32 %v403_v53, %v403_v53 }
 0x134   : > { %v408_v58 = vsel %vm389_vm0, %v404_v54, 0.0  ;;  %v409_v59 = vsel %vm389_vm0, %v405_v55, 0.0  ;;  %v411_v61 = vsel %vm389_vm0, %v406_v56, 0.0  ;;  %v413_v63 = vsel %vm389_vm0, %v407_v57, 0.0 }
 0x135   : > { %v410_v60 = vadd.f32 %v409_v59, %v408_v58 }
 0x137   : > { %v412_v62 = vadd.f32 %v411_v61, %v410_v60 }
 0x139   : > { %v414_v0 = vadd.f32 %v413_v63, %v412_v62 }
 0x13b   : > { %415 = vadd.xlane.f32.xlu0 %v414_v0 }
 0x1ae   : > { %v416_v1 = vpop.xlane.xlu0 %415 }
 0x1af   : > { %v417_v2 = vmul.f32 0.001953125, %v416_v1 }
 0x1b1   : > { %v418_v3 = vadd.f32 1e-05, %v417_v2 }
 0x1b3   : > { %695 = vrsqrt.f32 %v418_v3  ;;  %vm425_vm2 = vweird.f32 %v418_v3 }
 0x1b9   : > { %v696_v4 = vpop.eup %695 }
 0x1ba   : > { %v420_v5 = vmul.f32 %v696_v4, %v418_v3  ;;  %vm426_vm1 = vweird.f32 %v696_v4 }
 0x1bb   : > { %vm427_vm3 = vmor %vm425_vm2, %vm426_vm1 }
 0x1bc   : > { %v421_v6 = vmul.f32 %v696_v4, %v420_v5 }
 0x1be   : > { %v422_v7 = vmul.f32 0.5, %v421_v6 }
 0x1c0   : > { %v423_v8 = vsub.f32 1.5, %v422_v7 }
 0x1c2   : > { %v424_v9 = vmul.f32 %v696_v4, %v423_v8 }
 0x1c4   : > { %v428_v10 = vsel %vm427_vm3, %v696_v4, %v424_v9 }
 0x1c5   : > { %v429_v11 = vmul.f32 %v428_v10, %v400_v50  ;;  %v430_v12 = vmul.f32 %v428_v10, %v401_v51  ;;  %v431_v13 = vmul.f32 %v428_v10, %v402_v52  ;;  %v432_v14 = vmul.f32 %v428_v10, %v403_v53 }
 0x1c7   : > { %vm434_vm4 = vcmp.ge.f32.partialorder %v430_v12, 0.0  ;;  %vm435_vm5 = vcmp.ge.f32.partialorder %v431_v13, 0.0  ;;  %vm436_vm6 = vcmp.ge.f32.partialorder %v432_v14, 0.0  ;;  %v437_v15 = vmul.f32 0.05, %v429_v11 }
 0x1c8   : > { %v438_v16 = vmul.f32 0.05, %v430_v12  ;;  %v439_v17 = vmul.f32 0.05, %v431_v13  ;;  %vm433_vm7 = vcmp.ge.f32.partialorder %v429_v11, 0.0 }
 0x1c9   : > { %v440_v18 = vmul.f32 0.05, %v432_v14  ;;  %v441_v24 = vsel %vm433_vm7, %v429_v11, %v437_v15 }
 0x1ca   : > { %v442_v19 = vsel %vm434_vm4, %v430_v12, %v438_v16  ;;  %v443_v20 = vsel %vm435_vm5, %v431_v13, %v439_v17 }
 0x1cb   : > { %v444_v21 = vsel %vm436_vm6, %v432_v14, %v440_v18  ;;  %v449_v22 = vrot.slane %v442_v19, 6  ;;  %v450_v23 = vrot.slane %v443_v20, 4 }
 0x1cc   : > { %v451_v25 = vrot.slane %v444_v21, 2 }
 0x1cd   : > { %v452_v26 = vsel %vm389_vm0, %v441_v24, %v449_v22 }
 0x1ce   : > { %v454_v27 = vsel %vm453_vm8, %v450_v23, %v451_v25 }
 0x1cf   : > { %v456_v28 = vsel %vm455_vm9, %v452_v26, %v454_v27 }
 0x1d0   : > { %458 = vst [vmem:[%s143_s20] sm:$0xff] %v456_v28 }
 0x1d1 PF: > { %s12_s9 = sadd.s32 1, %s703_s9  }
 0x1d2   : > { %p9_p4 = scmp.ge.s32.totalorder %s12_s9, 4  }
 0x1d4   :  { %11 = sbr.rel (!%p9_p4) target bundleno = 1 (0x1), region = 58 }

// kernel: upconvblock_forward.5
= control target key start
LH: loop header
LB: loop body
LE: loop exit
PB: predicated region body
PF: predicated region fallthrough
CT: control target
= control target key end

     0   :  { %s718_s9 = smov 0   ;;  %s818_s0 = inlined_call_operand.vmem [shape: bf16[2,128,512], index: 0, kind: input, shape index: {}]   ;;  %s819_s1 = inlined_call_operand.vmem [shape: bf16[4,128], index: 1, kind: input, shape index: {}]   ;;  %s820_s2 = inlined_call_operand.vmem [shape: f32[2,4,512], index: 2, kind: output, shape index: {}]  }
   0x1 LB: > { %s512_s10 = sadd.s32 4294967295, %s701_s9   ;;  %p516_p0 = scmp.ge.s32.totalorder %s701_s9, 1  ;;  %s701_s9 = sphi %s718_s9, %s12_s9  }
   0x2   : > { %p112_p1 = scmp.lt.s32.totalorder %s701_s9, 3 }
   0x4   : > { %p113_p2 = pnand %p516_p0, %p112_p1 }
   0x5   : > { %p134_p3 = scmp.lt.s32.totalorder (!%p113_p2), %s512_s10, 1 }
   0x6   : > { %116 = sbr.rel (%p113_p2) target bundleno = 463 (0x1cf), region = 28 }
   0xb   : > { %s822_s10 = smov (!%p134_p3, %s512_s10), 1  ;;  %vm389_vm0 = vcmask 1043456  }
   0xc   : > { %s651_s11 = sshll.u32 %s822_s10, 8  ;;  %s652_s17 = sshll.u32 %s822_s10, 4 }
   0xd   : > { %s732_s14 = scalar_lea.vmem %s818_s0, %s651_s11  ;;  %s143_s20 = scalar_lea.vmem %s820_s2, %s652_s17 }
   0xe   : > { %v635_v0 = vld [vmem:[%s732_s14 + $0xe0] sm:$0xf]  ;;  %v683_v1 = vld [vmem:[%s732_s14 + $0xec] sm:$0xf0]  ;;  %v681_v2 = vld [vmem:[%s732_s14 + $0xe4] sm:$0xf] }
   0xf   : > { %v636_v3 = vor.u32 %v683_v1, %v635_v0  ;;  %v637_v4 = vld [vmem:[%s732_s14 + $0xf0] sm:$0xf0]  ;;  %v643_v5 = vld [vmem:[%s732_s14 + $0xe8] sm:$0xf]  ;;  %v684_v6 = vld [vmem:[%s732_s14 + $0xf4] sm:$0xf0] }
  0x10   : > { %v640_v7 = vor.u32 %v681_v2, %v637_v4  ;;  %v644_v8 = vor.u32 %v684_v6, %v643_v5  ;;  %v682_v9 = vld [vmem:[%s732_s14 + $0xec] sm:$0xf]  ;;  %v645_v10 = vld [vmem:[%s732_s14 + $0xf8] sm:$0xf0]  ;;  %v619_v11 = vld [vmem:[%s732_s14 + $0xc0] sm:$0xf] }
  0x11   : > { %337 = vmatpush.bf16.msra.mxu0 %v636_v3  ;;  %v648_v12 = vor.u32 %v682_v9, %v645_v10  ;;  %v679_v13 = vld [vmem:[%s732_s14 + $0xcc] sm:$0xf0]  ;;  %v677_v14 = vld [vmem:[%s732_s14 + $0xc4] sm:$0xf]  ;;  %v621_v15 = vld [vmem:[%s732_s14 + $0xd0] sm:$0xf0] }
  0x12   : > { %350 = vmatpush.bf16.msra.mxu1 %v640_v7  ;;  %363 = vmatpush.bf16.msra.mxu2 %v644_v8  ;;  %v620_v16 = vor.u32 %v679_v13, %v619_v11  ;;  %v624_v17 = vor.u32 %v677_v14, %v621_v15  ;;  %v627_v18 = vld [vmem:[%s732_s14 + $0xc8] sm:$0xf]  ;;  %v680_v19 = vld [vmem:[%s732_s14 + $0xd4] sm:$0xf0]  ;;  %v678_v20 = vld [vmem:[%s732_s14 + $0xcc] sm:$0xf] }
  0x13   : > { %376 = vmatpush.bf16.msra.mxu3 %v648_v12  ;;  %v628_v21 = vor.u32 %v680_v19, %v627_v18  ;;  %v629_v22 = vld [vmem:[%s732_s14 + $0xd8] sm:$0xf0]  ;;  %v603_v23 = vld [vmem:[%s732_s14 + $0xa0] sm:$0xf]  ;;  %v675_v24 = vld [vmem:[%s732_s14 + $0xac] sm:$0xf0] }
  0x14   : > { %v632_v25 = vor.u32 %v678_v20, %v629_v22  ;;  %v673_v26 = vld [vmem:[%s732_s14 + $0xa4] sm:$0xf]  ;;  %v605_v27 = vld [vmem:[%s732_s14 + $0xb0] sm:$0xf0]  ;;  %v611_v28 = vld [vmem:[%s732_s14 + $0xa8] sm:$0xf]  ;;  %v604_v29 = vor.u32 %v675_v24, %v603_v23 }
  0x15   : > { %338 = vmatpush.bf16.msra.mxu0 %v620_v16  ;;  %v676_v30 = vld [vmem:[%s732_s14 + $0xb4] sm:$0xf0]  ;;  %v674_v31 = vld [vmem:[%s732_s14 + $0xac] sm:$0xf]  ;;  %v613_v32 = vld [vmem:[%s732_s14 + $0xb8] sm:$0xf0]  ;;  %v608_v33 = vor.u32 %v673_v26, %v605_v27 }
  0x16   : > { %351 = vmatpush.bf16.msra.mxu1 %v624_v17  ;;  %364 = vmatpush.bf16.msra.mxu2 %v628_v21  ;;  %v612_v34 = vor.u32 %v676_v30, %v611_v28  ;;  %v587_v35 = vld [vmem:[%s732_s14 + $0x80] sm:$0xf]  ;;  %v671_v36 = vld [vmem:[%s732_s14 + $0x8c] sm:$0xf0]  ;;  %v669_v37 = vld [vmem:[%s732_s14 + $0x84] sm:$0xf]  ;;  %v616_v38 = vor.u32 %v674_v31, %v613_v32 }
  0x17   : > { %377 = vmatpush.bf16.msra.mxu3 %v632_v25  ;;  %v589_v39 = vld [vmem:[%s732_s14 + $0x90] sm:$0xf0]  ;;  %v595_v40 = vld [vmem:[%s732_s14 + $0x88] sm:$0xf]  ;;  %v672_v41 = vld [vmem:[%s732_s14 + $0x94] sm:$0xf0]  ;;  %v588_v44 = vor.u32 %v671_v36, %v587_v35 }
  0x18   : > { %v670_v42 = vld [vmem:[%s732_s14 + $0x8c] sm:$0xf]  ;;  %v597_v43 = vld [vmem:[%s732_s14 + $0x98] sm:$0xf0]  ;;  %v592_v45 = vor.u32 %v669_v37, %v589_v39  ;;  %v596_v46 = vor.u32 %v672_v41, %v595_v40  ;;  %v571_v47 = vld [vmem:[%s732_s14 + $0x60] sm:$0xf] }
  0x19   : > { %339 = vmatpush.bf16.msra.mxu0 %v604_v29  ;;  %v667_v48 = vld [vmem:[%s732_s14 + $0x6c] sm:$0xf0]  ;;  %v665_v49 = vld [vmem:[%s732_s14 + $0x64] sm:$0xf]  ;;  %v600_v50 = vor.u32 %v670_v42, %v597_v43  ;;  %v573_v51 = vld [vmem:[%s732_s14 + $0x70] sm:$0xf0] }
  0x1a   : > { %352 = vmatpush.bf16.msra.mxu1 %v608_v33  ;;  %365 = vmatpush.bf16.msra.mxu2 %v612_v34  ;;  %v579_v52 = vld [vmem:[%s732_s14 + $0x68] sm:$0xf]  ;;  %v668_v53 = vld [vmem:[%s732_s14 + $0x74] sm:$0xf0]  ;;  %v666_v54 = vld [vmem:[%s732_s14 + $0x6c] sm:$0xf]  ;;  %v572_v56 = vor.u32 %v667_v48, %v571_v47  ;;  %v576_v57 = vor.u32 %v665_v49, %v573_v51 }
  0x1b   : > { %378 = vmatpush.bf16.msra.mxu3 %v616_v38  ;;  %v581_v55 = vld [vmem:[%s732_s14 + $0x78] sm:$0xf0]  ;;  %v580_v58 = vor.u32 %v668_v53, %v579_v52  ;;  %v555_v59 = vld [vmem:[%s732_s14 + $0x40] sm:$0xf]  ;;  %v663_v60 = vld [vmem:[%s732_s14 + $0x4c] sm:$0xf0] }
  0x1c   : > { %v661_v61 = vld [vmem:[%s732_s14 + $0x44] sm:$0xf]  ;;  %v584_v62 = vor.u32 %v666_v54, %v581_v55  ;;  %v557_v63 = vld [vmem:[%s732_s14 + $0x50] sm:$0xf0]  ;;  %v563_v0 = vld [vmem:[%s732_s14 + $0x48] sm:$0xf]  ;;  %v556_v4 = vor.u32 %v663_v60, %v555_v59 }
  0x1d   : > { %340 = vmatpush.bf16.msra.mxu0 %v588_v44  ;;  %v664_v1 = vld [vmem:[%s732_s14 + $0x54] sm:$0xf0]  ;;  %v662_v2 = vld [vmem:[%s732_s14 + $0x4c] sm:$0xf]  ;;  %v565_v3 = vld [vmem:[%s732_s14 + $0x58] sm:$0xf0]  ;;  %v560_v5 = vor.u32 %v661_v61, %v557_v63 }
  0x1e   : > { %353 = vmatpush.bf16.msra.mxu1 %v592_v45  ;;  %366 = vmatpush.bf16.msra.mxu2 %v596_v46  ;;  %v564_v6 = vor.u32 %v664_v1, %v563_v0  ;;  %v539_v7 = vld [vmem:[%s732_s14 + $0x20] sm:$0xf]  ;;  %v659_v8 = vld [vmem:[%s732_s14 + $0x2c] sm:$0xf0]  ;;  %v657_v9 = vld [vmem:[%s732_s14 + $0x24] sm:$0xf]  ;;  %v568_v10 = vor.u32 %v662_v2, %v565_v3 }
  0x1f   : > { %379 = vmatpush.bf16.msra.mxu3 %v600_v50  ;;  %v541_v11 = vld [vmem:[%s732_s14 + $0x30] sm:$0xf0]  ;;  %v547_v12 = vld [vmem:[%s732_s14 + $0x28] sm:$0xf]  ;;  %v660_v13 = vld [vmem:[%s732_s14 + $0x34] sm:$0xf0]  ;;  %v540_v16 = vor.u32 %v659_v8, %v539_v7 }
  0x20   : > { %v658_v14 = vld [vmem:[%s732_s14 + $0x2c] sm:$0xf]  ;;  %v549_v15 = vld [vmem:[%s732_s14 + $0x38] sm:$0xf0]  ;;  %v544_v17 = vor.u32 %v657_v9, %v541_v11  ;;  %v548_v18 = vor.u32 %v660_v13, %v547_v12  ;;  %v523_v19 = vld [vmem:[%s732_s14] sm:$0xf] }
  0x21   : > { %341 = vmatpush.bf16.msra.mxu0 %v572_v56  ;;  %v655_v20 = vld [vmem:[%s732_s14 + $0xc] sm:$0xf0]  ;;  %v653_v21 = vld [vmem:[%s732_s14 + $0x4] sm:$0xf]  ;;  %v552_v22 = vor.u32 %v658_v14, %v549_v15  ;;  %v525_v23 = vld [vmem:[%s732_s14 + $0x10] sm:$0xf0] }
  0x22   : > { %354 = vmatpush.bf16.msra.mxu1 %v576_v57  ;;  %367 = vmatpush.bf16.msra.mxu2 %v580_v58  ;;  %v531_v24 = vld [vmem:[%s732_s14 + $0x8] sm:$0xf]  ;;  %v656_v25 = vld [vmem:[%s732_s14 + $0x14] sm:$0xf0]  ;;  %v654_v26 = vld [vmem:[%s732_s14 + $0xc] sm:$0xf]  ;;  %v524_v28 = vor.u32 %v655_v20, %v523_v19  ;;  %v528_v29 = vor.u32 %v653_v21, %v525_v23 }
  0x23   : > { %380 = vmatpush.bf16.msra.mxu3 %v584_v62  ;;  %v533_v27 = vld [vmem:[%s732_s14 + $0x18] sm:$0xf0]  ;;  %v532_v30 = vor.u32 %v656_v25, %v531_v24  ;;  %v144_v32 = vld [vmem:[%s819_s1] sm:$0x3] }
  0x24   : > { %v536_v31 = vor.u32 %v654_v26, %v533_v27 }
  0x25   : > { %342 = vmatpush.bf16.msra.mxu0 %v556_v4 }
  0x26   : > { %355 = vmatpush.bf16.msra.mxu1 %v560_v5  ;;  %368 = vmatpush.bf16.msra.mxu2 %v564_v6 }
  0x27   : > { %381 = vmatpush.bf16.msra.mxu3 %v568_v10 }
  0x29   : > { %343 = vmatpush.bf16.msra.mxu0 %v540_v16 }
  0x2a   : > { %356 = vmatpush.bf16.msra.mxu1 %v544_v17  ;;  %369 = vmatpush.bf16.msra.mxu2 %v548_v18 }
  0x2b   : > { %382 = vmatpush.bf16.msra.mxu3 %v552_v22 }
  0x2d   : > { %344 = vmatpush.bf16.msra.mxu0 %v524_v28 }
  0x2e   : > { %357 = vmatpush.bf16.msra.mxu1 %v528_v29  ;;  %370 = vmatpush.bf16.msra.mxu2 %v532_v30 }
  0x2f   : > { %383 = vmatpush.bf16.msra.mxu3 %v536_v31 }
  0x30   : > { %345 = vmatmul.bf16.vlgmr.msra.gmra.mxu0 %v144_v32 }
  0x31   : > { %358 = vmatmul.bf16.vlgmr.msra.gmra.mxu1 %v144_v32  ;;  %371 = vmatmul.bf16.vlgmr.msra.gmra.mxu2 %v144_v32 }
  0x32   : > { %384 = vmatmul.bf16.vlgmr.msra.gmra.mxu3 %v144_v32 }
  0xad   : > { %v346_v33 = vpop.f32.mrf.mxu0 }
  0xae   : > { %v359_v34 = vpop.f32.mrf.mxu1  ;;  %v390_v35 = vsel %vm389_vm0, %v346_v33, 0.0 }
  0xaf   : > { %v391_v36 = vsel %vm389_vm0, %v359_v34, 0.0 }
  0xb0   : > { %v392_v37 = vadd.f32 %v391_v36, %v390_v35 }
  0xb4   : > { %v372_v38 = vpop.f32.mrf.mxu2 }
  0xb5   : > { %v393_v39 = vsel %vm389_vm0, %v372_v38, 0.0  ;;  %v385_v40 = vpop.f32.mrf.mxu3  ;;  %v348_v41 = vpop.f32.mrf.mxu0 }
  0xb6   : > { %v361_v42 = vpop.f32.mrf.mxu1  ;;  %v394_v43 = vadd.f32 %v393_v39, %v392_v37  ;;  %v395_v44 = vsel %vm389_vm0, %v385_v40, 0.0 }
  0xb8   : > { %v396_v45 = vadd.f32 %v395_v44, %v394_v43 }
  0xba   : > { %397 = vadd.xlane.f32.xlu0 %v396_v45 }
  0xbc   : > { %v374_v46 = vpop.f32.mrf.mxu2 }
  0xbd   : > { %v387_v47 = vpop.f32.mrf.mxu3 }
 0x12d   : > { %v398_v48 = vpop.xlane.xlu0 %397 }
 0x12e   : > { %v399_v49 = vmul.f32 0.001953125, %v398_v48 }
 0x130   : > { %v400_v50 = vsub.f32 %v346_v33, %v399_v49  ;;  %v401_v51 = vsub.f32 %v359_v34, %v399_v49  ;;  %v402_v52 = vsub.f32 %v372_v38, %v399_v49  ;;  %v403_v53 = vsub.f32 %v385_v40, %v399_v49 }
 0x132   : > { %v404_v54 = vmul.f32 %v400_v50, %v400_v50  ;;  %v405_v55 = vmul.f32 %v401_v51, %v401_v51  ;;  %v406_v56 = vmul.f32 %v402_v52, %v402_v52  ;;  %v407_v57 = vmul.f32 %v403_v53, %v403_v53 }
 0x134   : > { %v408_v58 = vsel %vm389_vm0, %v404_v54, 0.0  ;;  %v409_v59 = vsel %vm389_vm0, %v405_v55, 0.0  ;;  %v411_v61 = vsel %vm389_vm0, %v406_v56, 0.0  ;;  %v413_v63 = vsel %vm389_vm0, %v407_v57, 0.0 }
 0x135   : > { %v410_v60 = vadd.f32 %v409_v59, %v408_v58 }
 0x137   : > { %v412_v62 = vadd.f32 %v411_v61, %v410_v60 }
 0x139   : > { %v414_v0 = vadd.f32 %v413_v63, %v412_v62 }
 0x13b   : > { %415 = vadd.xlane.f32.xlu0 %v414_v0 }
 0x1ae   : > { %v416_v1 = vpop.xlane.xlu0 %415 }
 0x1af   : > { %v417_v2 = vmul.f32 0.001953125, %v416_v1 }
 0x1b1   : > { %v418_v3 = vadd.f32 1e-05, %v417_v2 }
 0x1b3   : > { %693 = vrsqrt.f32 %v418_v3  ;;  %vm425_vm2 = vweird.f32 %v418_v3 }
 0x1b9   : > { %v694_v4 = vpop.eup %693 }
 0x1ba   : > { %v420_v5 = vmul.f32 %v694_v4, %v418_v3  ;;  %vm426_vm1 = vweird.f32 %v694_v4 }
 0x1bb   : > { %vm427_vm3 = vmor %vm425_vm2, %vm426_vm1 }
 0x1bc   : > { %v421_v6 = vmul.f32 %v694_v4, %v420_v5 }
 0x1be   : > { %v422_v7 = vmul.f32 0.5, %v421_v6 }
 0x1c0   : > { %v423_v8 = vsub.f32 1.5, %v422_v7 }
 0x1c2   : > { %v424_v9 = vmul.f32 %v694_v4, %v423_v8 }
 0x1c4   : > { %v428_v10 = vsel %vm427_vm3, %v694_v4, %v424_v9 }
 0x1c5   : > { %v429_v11 = vmul.f32 %v428_v10, %v400_v50  ;;  %v430_v12 = vmul.f32 %v428_v10, %v401_v51  ;;  %v431_v13 = vmul.f32 %v428_v10, %v402_v52  ;;  %v432_v14 = vmul.f32 %v428_v10, %v403_v53 }
 0x1c7   : > { %vm434_vm4 = vcmp.ge.f32.partialorder %v430_v12, 0.0  ;;  %vm436_vm5 = vcmp.ge.f32.partialorder %v432_v14, 0.0  ;;  %v437_v15 = vmul.f32 0.05, %v429_v11  ;;  %v438_v16 = vmul.f32 0.05, %v430_v12 }
 0x1c8   : > { %vm433_vm6 = vcmp.ge.f32.partialorder %v429_v11, 0.0  ;;  %v439_v17 = vmul.f32 0.05, %v431_v13  ;;  %v440_v18 = vmul.f32 0.05, %v432_v14  ;;  %vm435_vm7 = vcmp.ge.f32.partialorder %v431_v13, 0.0 }
 0x1c9   : > { %v442_v19 = vsel %vm434_vm4, %v430_v12, %v438_v16  ;;  %v441_v22 = vsel %vm433_vm6, %v429_v11, %v437_v15 }
 0x1ca   : > { %v444_v20 = vsel %vm436_vm5, %v432_v14, %v440_v18  ;;  %v449_v21 = vrot.slane %v442_v19, 4  ;;  %v443_v24 = vsel %vm435_vm7, %v431_v13, %v439_v17 }
 0x1cb   : > { %v450_v23 = vrot.slane %v444_v20, 4 }
 0x1cc   : > { %v451_v25 = vsel %vm389_vm0, %v441_v22, %v449_v21 }
 0x1cd   : > { %v452_v26 = vsel %vm389_vm0, %v443_v24, %v450_v23  ;;  %455 = vst [vmem:[%s143_s20] sm:$0xff] %v451_v25 }
 0x1ce   : > { %456 = vst [vmem:[%s143_s20 + $0x8] sm:$0xff] %v452_v26 }
 0x1cf PF: > { %s12_s9 = sadd.s32 1, %s701_s9  }
 0x1d0   : > { %p9_p4 = scmp.ge.s32.totalorder %s12_s9, 4  }
 0x1d2   :  { %11 = sbr.rel (!%p9_p4) target bundleno = 1 (0x1), region = 58 }

</bundles_post_ra>
